<compile_context>
chip_gen: v7x
topology: tpu7x:2x2x1
jax: 0.10.0
libtpu: 0.0.40
codegen_flags: <defaults>
</compile_context>

<pallas_src>
import functools

import jax
import jax.numpy as jnp
from jax import lax
from jax.experimental import pallas as pl
from jax.experimental.pallas import tpu as pltpu


def _round_up(x, m):
    return (x + m - 1) // m * m


def _single_linear_kernel(x_ref, w_ref, gb_ref, o_ref, *, eps, inv_b):
    x = x_ref[...]                                   # (B, fan_in)      bf16
    w = w_ref[...]                                   # (TN, fan_in)     bf16

    # y = x @ W^T : contract dim 1 of x with dim 1 of w (MXU takes the transposed
    # operand natively, no materialized transpose); f32 accumulation.
    y = lax.dot_general(
        x, w, (((1,), (1,)), ((), ())),
        preferred_element_type=jnp.float32)          # (B, TN) f32

    # BatchNorm1d (training mode: batch mean, biased variance), folded to one FMA.
    mean = jnp.sum(y, axis=0, keepdims=True) * inv_b       # (1, TN)
    d = y - mean
    var = jnp.sum(d * d, axis=0, keepdims=True) * inv_b    # (1, TN)

    gamma = gb_ref[0:1, :]                                  # (1, TN) f32
    beta = gb_ref[1:2, :]                                   # (1, TN) f32
    scale = gamma * lax.rsqrt(var + eps)                    # EUP rsqrt (free slot)
    shift = beta - mean * scale

    # ReLU fused with the scale/shift FMA; full-lane (128-multiple) store.
    o_ref[...] = jnp.maximum(y * scale + shift, 0.0).astype(o_ref.dtype)


def prepare_params(weight, gamma, beta, *, matmul_dtype=jnp.bfloat16):
    """One-time parameter prep (hoisted out of the per-forward path):
    pick a feature tile TN, pad fan_out to a multiple of TN, cast W to the matmul
    dtype, and pack gamma/beta into a single (2, fan_out_p) f32 tile."""
    fan_out, fan_in = weight.shape

    # Feature tile: 256/512 multiples keep the v6e/v7x 2x256^2 MXU full; 128 for
    # small layers (also fine for v5e's 4x128^2 MXU).
    if fan_out <= 128:
        tn = 128
    else:
        fan_out_p = _round_up(fan_out, 256)
        tn = 512 if fan_out_p % 512 == 0 else 256
    # Cap the double-buffered weight tile (~<= 8 MiB each) so it fits comfortably
    # inside v7x's 64 MiB physical / 32 MiB scoped VMEM.
    itemsize = jnp.dtype(matmul_dtype).itemsize
    while tn > 128 and tn * fan_in * itemsize > (8 << 20):
        tn //= 2

    fan_out_p = _round_up(fan_out, tn)
    pad = fan_out_p - fan_out
    if pad:
        weight = jnp.pad(weight, ((0, pad), (0, 0)))
        gamma = jnp.pad(gamma, (0, pad))
        beta = jnp.pad(beta, (0, pad))

    return {
        "w": weight.astype(matmul_dtype),                       # (fan_out_p, fan_in)
        "gb": jnp.stack([gamma, beta], 0).astype(jnp.float32),  # (2, fan_out_p)
        "fan_out": fan_out,
        "tn": tn,
    }


def single_linear_layer(x, params, *, eps=1e-5):
    """x: (B, fan_in) f32; params: output of prepare_params. Returns (B, fan_out) f32."""
    w, gb = params["w"], params["gb"]
    fan_out, tn = params["fan_out"], params["tn"]
    B, fan_in = x.shape
    fan_out_p = w.shape[0]

    x_mm = x.astype(w.dtype)   # bf16 matmul operand; BN math stays f32 in-kernel.

    kernel = functools.partial(
        _single_linear_kernel, eps=float(eps), inv_b=1.0 / float(B))

    out = pl.pallas_call(
        kernel,
        out_shape=jax.ShapeDtypeStruct((B, fan_out_p), jnp.float32),
        grid=(fan_out_p // tn,),
        in_specs=[
            # x: same block index every step -> stays resident in VMEM (no re-DMA).
            pl.BlockSpec((B, fan_in), lambda j: (0, 0)),
            # weight tile streams over fan_out; double-buffered by the pipeline.
            pl.BlockSpec((tn, fan_in), lambda j: (j, 0)),
            # fused gamma/beta tile.
            pl.BlockSpec((2, tn), lambda j: (0, j)),
        ],
        out_specs=pl.BlockSpec((B, tn), lambda j: (0, j)),
        compiler_params=pltpu.CompilerParams(
            dimension_semantics=("parallel",),   # shard feature tiles across v7x TCs
            vmem_limit_bytes=48 << 20,
        ),
    )(x_mm, w, gb)

    return out[:, :fan_out] if fan_out_p != fan_out else out


def _reference(x, weight, gamma, beta, eps=1e-5):
    y = x @ weight.T
    mean = jnp.mean(y, axis=0, keepdims=True)
    var = jnp.mean((y - mean) ** 2, axis=0, keepdims=True)
    y = (y - mean) / jnp.sqrt(var + eps) * gamma[None, :] + beta[None, :]
    return jnp.maximum(y, 0.0)


if __name__ == "__main__":
    key = jax.random.PRNGKey(0)
    k_x, k_w = jax.random.split(key, 2)

    B, fan_in, fan_out = 8, 32, 64

    x = jax.random.normal(k_x, (B, fan_in), dtype=jnp.float32)
    # nn.Linear kaiming-uniform-style init: U(-1/sqrt(fan_in), 1/sqrt(fan_in))
    bound = 1.0 / (fan_in ** 0.5)
    weight = jax.random.uniform(k_w, (fan_out, fan_in), dtype=jnp.float32,
                                minval=-bound, maxval=bound)
    # BatchNorm1d init: gamma=1, beta=0.
    gamma = jnp.ones((fan_out,), dtype=jnp.float32)
    beta = jnp.zeros((fan_out,), dtype=jnp.float32)

    params = prepare_params(weight, gamma, beta)        # one-time prep, not per-forward
    out = single_linear_layer(x, params, eps=1e-5)
    out = jax.block_until_ready(out)

    ref = _reference(x, weight, gamma, beta, eps=1e-5)
    assert out.shape == (B, fan_out)
    # bf16 matmul operands (f32 accumulation / BN math) -> tolerance loosened deliberately.
    assert jnp.allclose(out, ref, atol=2e-2, rtol=2e-2), "mismatch vs reference"

    print("KERNEL_OK")
</pallas_src>

<mosaic_0001>
module attributes {stable_mosaic.version = 11 : i64} {
  func.func @_single_linear_kernel(%arg0: i32, %arg1: memref<8x32xbf16, #tpu.memory_space<vmem>>, %arg2: memref<128x32xbf16, #tpu.memory_space<vmem>>, %arg3: memref<2x128xf32, #tpu.memory_space<vmem>>, %arg4: memref<8x128xf32, #tpu.memory_space<vmem>>) attributes {dimension_semantics = [#tpu.dimension_semantics<parallel>], iteration_bounds = array<i64: 1>, scalar_prefetch = 0 : i64, scratch_operands = 0 : i64, tpu.core_type = #tpu.core_type<tc>, window_params = [{pipeline_mode = #tpu.pipeline_mode<synchronous>, transform_indices = @transform_0, window_bounds = array<i64: 8, 32>}, {transform_indices = @transform_1, window_bounds = array<i64: 128, 32>}, {transform_indices = @transform_2, window_bounds = array<i64: 2, 128>}, {transform_indices = @transform_3, window_bounds = array<i64: 8, 128>}]} {
    %c0 = arith.constant 0 : index
    %c0_0 = arith.constant 0 : index
    %0 = vector.load %arg1[%c0, %c0_0] : memref<8x32xbf16, #tpu.memory_space<vmem>>, vector<8x32xbf16>
    %c0_1 = arith.constant 0 : index
    %c0_2 = arith.constant 0 : index
    %1 = vector.load %arg2[%c0_1, %c0_2] : memref<128x32xbf16, #tpu.memory_space<vmem>>, vector<128x32xbf16>
    %cst = arith.constant dense<0.000000e+00> : vector<8x128xf32>
    %2 = tpu.matmul %0, %1, %cst {dimension_numbers = #tpu.dot_dimension_numbers<[1], [1], [0], [0], [0, 0, 1, 0], [], []>} : vector<8x32xbf16>, vector<128x32xbf16>, vector<8x128xf32> -> vector<8x128xf32>
    %cst_3 = arith.constant dense<0.000000e+00> : vector<128xf32>
    %3 = vector.multi_reduction <add>, %2, %cst_3 [0] : vector<8x128xf32> to vector<128xf32>
    %4 = vector.shape_cast %3 : vector<128xf32> to vector<1x128xf32>
    %cst_4 = arith.constant 1.250000e-01 : f32
    %5 = vector.broadcast %cst_4 : f32 to vector<1x128xf32>
    %6 = arith.mulf %4, %5 : vector<1x128xf32>
    %7 = vector.broadcast %6 : vector<1x128xf32> to vector<8x128xf32>
    %8 = arith.subf %2, %7 : vector<8x128xf32>
    %9 = arith.mulf %8, %8 : vector<8x128xf32>
    %cst_5 = arith.constant dense<0.000000e+00> : vector<128xf32>
    %10 = vector.multi_reduction <add>, %9, %cst_5 [0] : vector<8x128xf32> to vector<128xf32>
    %11 = vector.shape_cast %10 : vector<128xf32> to vector<1x128xf32>
    %cst_6 = arith.constant 1.250000e-01 : f32
    %12 = vector.broadcast %cst_6 : f32 to vector<1x128xf32>
    %13 = arith.mulf %11, %12 : vector<1x128xf32>
    %c0_7 = arith.constant 0 : index
    %c0_8 = arith.constant 0 : index
    %14 = vector.load %arg3[%c0_7, %c0_8] : memref<2x128xf32, #tpu.memory_space<vmem>>, vector<1x128xf32>
    %c1 = arith.constant 1 : index
    %c0_9 = arith.constant 0 : index
    %15 = vector.load %arg3[%c1, %c0_9] : memref<2x128xf32, #tpu.memory_space<vmem>>, vector<1x128xf32>
    %cst_10 = arith.constant 9.99999974E-6 : f32
    %16 = vector.broadcast %cst_10 : f32 to vector<1x128xf32>
    %17 = arith.addf %13, %16 : vector<1x128xf32>
    %18 = math.rsqrt %17 : vector<1x128xf32>
    %19 = arith.mulf %14, %18 : vector<1x128xf32>
    %20 = arith.mulf %6, %19 : vector<1x128xf32>
    %21 = arith.subf %15, %20 : vector<1x128xf32>
    %22 = vector.broadcast %19 : vector<1x128xf32> to vector<8x128xf32>
    %23 = arith.mulf %2, %22 : vector<8x128xf32>
    %24 = vector.broadcast %21 : vector<1x128xf32> to vector<8x128xf32>
    %25 = arith.addf %23, %24 : vector<8x128xf32>
    %cst_11 = arith.constant 0.000000e+00 : f32
    %26 = vector.broadcast %cst_11 : f32 to vector<8x128xf32>
    %27 = arith.maximumf %25, %26 : vector<8x128xf32>
    %c0_12 = arith.constant 0 : index
    %c0_13 = arith.constant 0 : index
    %28 = vector.load %arg4[%c0_12, %c0_13] : memref<8x128xf32, #tpu.memory_space<vmem>>, vector<8x128xf32>
    tpu.vector_store %arg4[%c0_12, %c0_13], %27 {strides = array<i32>} : memref<8x128xf32, #tpu.memory_space<vmem>>, vector<8x128xf32>,
    return
  }
  func.func @transform_0(%arg0: i32) -> (i32, i32) {
    %c0_i32 = arith.constant 0 : i32
    %c0_i32_0 = arith.constant 0 : i32
    %c0_i32_1 = arith.constant 0 : i32
    return %c0_i32, %c0_i32_0 : i32, i32
  }
  func.func @transform_1(%arg0: i32) -> (i32, i32) {
    %c0_i32 = arith.constant 0 : i32
    %c0_i32_0 = arith.constant 0 : i32
    return %arg0, %c0_i32 : i32, i32
  }
  func.func @transform_2(%arg0: i32) -> (i32, i32) {
    %c0_i32 = arith.constant 0 : i32
    %c0_i32_0 = arith.constant 0 : i32
    return %c0_i32, %arg0 : i32, i32
  }
  func.func @transform_3(%arg0: i32) -> (i32, i32) {
    %c0_i32 = arith.constant 0 : i32
    %c0_i32_0 = arith.constant 0 : i32
    return %c0_i32, %arg0 : i32, i32
  }
}

</mosaic_0001>

<bundles_post_ra>
// kernel: tpu_custom_call.1
= control target key start
LH: loop header
LB: loop body
LE: loop exit
PB: predicated region body
PF: predicated region fallthrough
CT: control target
= control target key end

     0   :  { %v265_v1 = vmov 0.0   ;;  %vm73_vm0 = vcmask 261120   ;;  %s342_s0 = inlined_call_operand.vmem [shape: bf16[8,32], index: 0, kind: input, shape index: {}]   ;;  %s343_s1 = inlined_call_operand.vmem [shape: bf16[128,32], index: 1, kind: input, shape index: {}]   ;;  %s344_s2 = inlined_call_operand.vmem [shape: f32[2,128], index: 2, kind: input, shape index: {}]   ;;  %s345_s3 = inlined_call_operand.hbm [shape: f32[8,128], index: 3, kind: output, shape index: {}]  }
   0x1   :  { %v231_v0 = vld [vmem:[%s343_s1] sm:$0xff]   ;;  %208 = vmatprep.subr.bf16.mxu0 %v265_v1  ;;  %v232_v3 = vld [vmem:[%s343_s1 + $0x8] sm:$0xff]  }
   0x2   :  { %v78_v2 = vsel %vm73_vm0, %v231_v0, 0  ;;  %v81_v4 = vsel %vm73_vm0, %v232_v3, 0 }
   0x3   :  { %209 = vmatpush3.bf16.xpose.msra.mxu0 %v78_v2 }
   0x4   :  { %210 = vmatprep.subr.bf16.mxu0 %v265_v1 }
   0x5   :  { %8 = vsyncpa [#allocation3], 0  ;;  %vm266_vm1 = vmmov 0   ;;  %v233_v5 = vld [vmem:[%s343_s1 + $0x10] sm:$0xff]   ;;  %v234_v7 = vld [vmem:[%s343_s1 + $0x18] sm:$0xff]   ;;  %v164_v39 = vlaneseq  ;;  %s267_s5 = smov [#allocation2]  }
   0x6   :  { %224 = vmatprep.mubr.msk.bf16.mxu0 %vm266_vm1, %v265_v1  ;;  %v84_v6 = vsel %vm73_vm0, %v233_v5, 0  ;;  %v87_v8 = vsel %vm73_vm0, %v234_v7, 0  ;;  %v235_v9 = vld [vmem:[%s343_s1 + $0x20] sm:$0xff]   ;;  %v236_v11 = vld [vmem:[%s343_s1 + $0x28] sm:$0xff]   ;;  %v237_v13 = vld [vmem:[%s343_s1 + $0x30] sm:$0xff]   ;;  %s182_s6 = sshll.u32 %s267_s5, 4  ;;  %s183_s6 = int_to_ptr.vmem [resolvable:$true] %s182_s6 }
   0x7   :  { %v90_v10 = vsel %vm73_vm0, %v235_v9, 0  ;;  %v93_v12 = vsel %vm73_vm0, %v236_v11, 0  ;;  %v96_v14 = vsel %vm73_vm0, %v237_v13, 0  ;;  %v238_v15 = vld [vmem:[%s343_s1 + $0x38] sm:$0xff]   ;;  %v16_v17 = vld [vmem:[%s342_s0] sm:$0xf]  ;;  %p246_p1 = scmp.lt.s32.totalorder %s183_s6, %s183_s6 }
   0x8   :  { %v99_v16 = vsel %vm73_vm0, %v238_v15, 0  ;;  %v165_v40 = vshrl.u32 %v164_v39, 7  ;;  %v157_v41 = vld [vmem:[%s344_s2] sm:$0x1]  ;;  %v158_v45 = vld [vmem:[%s344_s2 + $0x1] sm:$0x1] }
   0x9   :  { %s241_s7 = scalar_lea.vmem %s183_s6, 128 }
   0xa   :  { %v166_v42 = vsub.s32 0, %v165_v40  ;;  %p242_p0 = scmp.ne.s32.totalorder %s183_s6, %s241_s7  ;;  %p247_p2 = scmp.lt.s32.totalorder %s241_s7, %s241_s7 }
   0xb   :  { %211 = vmatpush3.bf16.xpose.msra.mxu0 %v81_v4 }
   0xc   :  { %212 = vmatprep.subr.bf16.mxu0 %v265_v1  ;;  %p248_p3 = por %p247_p2, %p246_p1 }
   0xe   :  { %p249_p4 = pnand %p248_p3, %p242_p0 }
  0x13   :  { %213 = vmatpush3.bf16.xpose.msra.mxu0 %v84_v6 }
  0x14   :  { %214 = vmatprep.subr.bf16.mxu0 %v265_v1 }
  0x1b   :  { %215 = vmatpush3.bf16.xpose.msra.mxu0 %v87_v8 }
  0x1c   :  { %216 = vmatprep.subr.bf16.mxu0 %v265_v1 }
  0x23   :  { %217 = vmatpush3.bf16.xpose.msra.mxu0 %v90_v10 }
  0x24   :  { %218 = vmatprep.subr.bf16.mxu0 %v265_v1 }
  0x2b   :  { %219 = vmatpush3.bf16.xpose.msra.mxu0 %v93_v12 }
  0x2c   :  { %220 = vmatprep.subr.bf16.mxu0 %v265_v1 }
  0x33   :  { %221 = vmatpush3.bf16.xpose.msra.mxu0 %v96_v14 }
  0x34   :  { %222 = vmatprep.subr.bf16.mxu0 %v265_v1 }
  0x3b   :  { %223 = vmatpush3.bf16.xpose.msra.mxu0 %v99_v16 }
  0x42   :  { %225 = vmatmul.mubr.msk.bf16.vlgmr.msra.gmra.mrb[0].mxu0 %vm73_vm0, %v16_v17 }
 0x115   :  { %v135_v18 = vpop.f32.mrb[0].mxu0 }
 0x116   :  { %v141_v19 = vrot.slane %v135_v18, 4  ;;  %v226_v20 = vpop.f32.mrb[1].mxu0 }
 0x117   :  { %v138_v21 = vpop.f32.mrb[2].mxu0 }
 0x118   :  { %v142_v22 = vadd.f32 %v141_v19, %v135_v18  ;;  %v227_v23 = vpop.f32.mrb[3].mxu0 }
 0x11a   :  { %v143_v24 = vrot.slane %v142_v22, 2 }
 0x11c   :  { %v144_v25 = vadd.f32 %v143_v24, %v142_v22 }
 0x11e   :  { %v145_v26 = vrot.slane %v144_v25, 1 }
 0x120   :  { %v146_v27 = vadd.f32 %v145_v26, %v144_v25 }
 0x122   :  { %v147_v28 = vmul.f32 0.125, %v146_v27 }
 0x124   :  { %v148_v29 = vsub.f32 %v135_v18, %v147_v28 }
 0x126   :  { %v149_v30 = vmul.f32 %v148_v29, %v148_v29 }
 0x128   :  { %v150_v31 = vrot.slane %v149_v30, 4 }
 0x12a   :  { %v151_v32 = vadd.f32 %v150_v31, %v149_v30 }
 0x12c   :  { %v152_v33 = vrot.slane %v151_v32, 2 }
 0x12e   :  { %v153_v34 = vadd.f32 %v152_v33, %v151_v32 }
 0x130   :  { %v154_v35 = vrot.slane %v153_v34, 1 }
 0x132   :  { %v155_v36 = vadd.f32 %v154_v35, %v153_v34 }
 0x134   :  { %v156_v37 = vmul.f32 0.125, %v155_v36 }
 0x136   :  { %v159_v38 = vadd.f32 1e-05, %v156_v37 }
 0x138   :  { %239 = vrsqrt.f32 %v159_v38 }
 0x142   :  { %v240_v43 = vpop.eup %239 }
 0x143   :  { %v161_v44 = vmul.f32 %v240_v43, %v157_v41 }
 0x145   :  { %v162_v46 = vmul.f32 %v161_v44, %v147_v28  ;;  %v167_v47 = vrot.slane %v161_v44, %v166_v42 }
 0x147   :  { %v163_v48 = vsub.f32 %v158_v45, %v162_v46  ;;  %v168_v49 = vmul.f32 %v167_v47, %v135_v18 }
 0x149   :  { %v172_v50 = vrot.slane %v163_v48, %v166_v42 }
 0x14b   :  { %v173_v51 = vadd.f32 %v172_v50, %v168_v49 }
 0x14d   :  { %v174_v52 = vmax.f32 %v173_v51, 0.0 }
 0x14f   :  { %175 = vst [vmem:[#allocation2] sm:$0xff] %v174_v52 }
 0x150   :  { %252 = shalt.err (!%p249_p4)
}
 0x151   :  { %s253_s9 = scalar_lea.hbm %s345_s3, 128 }
 0x152   :  { %p254_p5 = scmp.ne.s32.totalorder %s345_s3, %s253_s9  ;;  %p257_p6 = scmp.lt.u32.totalorder %s253_s9, %s345_s3 }
 0x154   :  { %p259_p7 = pnand %p257_p6, %p254_p5 }
 0x156   :  { %262 = shalt.err (!%p259_p7)
}
 0x157   :  { %185 = dma.vmem_to_hbm [thread:$0]  %s183_s6, 128, %s345_s3, [#allocation3]  }
 0x158   :  { %263 = dma.done.wait [#allocation3], 128  }
 0x159   :  { %264 = vsyncadd [#allocation3], 4294967168 }
 0x15a   :  { %189 = vsyncpa [#allocation3], 1 }

</bundles_post_ra>
